<compile_context>
chip_gen: v7x
topology: tpu7x:2x2x1
jax: 0.10.0
libtpu: 0.0.40
codegen_flags: <defaults>
</compile_context>

<pallas_src>
import functools
import inspect

import jax
import jax.numpy as jnp
from jax import lax
from jax.experimental import pallas as pl
from jax.experimental.pallas import tpu as pltpu

_LANE = 128
_SUBLANE = 8


def _round_up(n, m):
    return ((n + m - 1) // m) * m


def _lane_pad(n):
    # Pad sub-128 feature dims up to one full lane width; leave >=128 alone.
    return _LANE if n < _LANE else n


def _pad_axis(a, axis, new_size):
    pad = new_size - a.shape[axis]
    if pad <= 0:
        return a
    widths = [(0, 0)] * a.ndim
    widths[axis] = (0, pad)
    return jnp.pad(a, widths)


# Does this JAX expose per-BlockSpec buffer-count control?
try:
    _HAS_PIPELINE_MODE = (
        hasattr(pl, "Buffered")
        and "pipeline_mode" in inspect.signature(pl.BlockSpec).parameters
    )
except (TypeError, ValueError):
    _HAS_PIPELINE_MODE = False


def _resident_spec(block_shape):
    """BlockSpec for a grid-invariant operand (weights / biases).

    index_map is constant, so double-buffering buys nothing — single-buffer
    it when the installed JAX supports pipeline_mode.
    """
    index_map = lambda i: (0,) * len(block_shape)
    if _HAS_PIPELINE_MODE:
        return pl.BlockSpec(block_shape, index_map, pipeline_mode=pl.Buffered(1))
    return pl.BlockSpec(block_shape, index_map)


def _vmem_limits():
    """Return (vmem_limit_bytes or None, tile-sizing budget bytes)."""
    cap = None
    try:
        cap = int(getattr(pltpu.get_tpu_info(), "vmem_capacity_bytes", 0)) or None
    except Exception:
        cap = None
    if cap is None:
        # Unknown chip: keep the compiler-default scoped limit; size tiles
        # against the smallest common default (v5e: 16 MiB).
        return None, 16 << 20
    # ~75% of physical, never below the 16 MiB default nor above 100 MiB.
    limit = min(cap, max((cap * 3) // 4, 16 << 20), 100 << 20)
    return limit, limit


def _make_relax_kernel(if_relu: bool, scale: float):
    """Fused MLP + normalization + relaxation noise. Two outputs (x, x_rel)."""

    def kernel(x_ref, w1_ref, b1_ref, w2_ref, b2_ref, noise_ref,
               out_ref, rel_ref):
        x = x_ref[...]                                            # (TB, D_in)
        # layer 1
        h = jnp.dot(x, w1_ref[...], preferred_element_type=jnp.float32)
        h = h + b1_ref[...]                                       # (1, Hp) bcast
        h = jnp.maximum(h, 0.0) if if_relu else jnp.tanh(h)
        # layer 2
        y = jnp.dot(h, w2_ref[...], preferred_element_type=jnp.float32)
        y = y + b2_ref[...]                                       # (TB, Dp)
        # fused per-row power normalization + relaxation scale:
        #   y *= sqrt(D_out)*sqrt(0.5)*sqrt(1-sigma^2) / ||y||_2
        inv = scale * lax.rsqrt(jnp.sum(y * y, axis=1, keepdims=True))
        y = y * inv
        out_ref[...] = y
        # TODO(synk): PyTorch detaches x_rel; forward values are identical here.
        rel_ref[...] = y + noise_ref[...]

    return kernel


def _make_plain_kernel(if_relu: bool, scale: float):
    """Fused MLP + normalization, no relaxation. Single output."""

    def kernel(x_ref, w1_ref, b1_ref, w2_ref, b2_ref, out_ref):
        x = x_ref[...]
        h = jnp.dot(x, w1_ref[...], preferred_element_type=jnp.float32)
        h = h + b1_ref[...]
        h = jnp.maximum(h, 0.0) if if_relu else jnp.tanh(h)
        y = jnp.dot(h, w2_ref[...], preferred_element_type=jnp.float32)
        y = y + b2_ref[...]
        inv = scale * lax.rsqrt(jnp.sum(y * y, axis=1, keepdims=True))
        out_ref[...] = y * inv

    return kernel


@functools.partial(jax.jit, static_argnames=("if_bias", "if_relu", "relax_sigma"))
def meta_transmitter_forward(x, var, noise, *, if_bias, if_relu, relax_sigma):
    """JAX/Pallas equivalent of meta_transmitter.forward.

    x     : (B, D_in) float32
    var   : PyTorch-layout params: (w1, b1, w2, b2) if if_bias else (w1, w2),
            wi shaped (out_i, in_i), bi shaped (out_i,)
    noise : (B, D_out) float32 — stand-in for Noise_relax.sample() per row
            (ignored and never DMA'd when relax_sigma == 0)
    """
    if if_bias:
        w1, b1, w2, b2 = var
    else:
        w1, w2 = var
        b1 = jnp.zeros((w1.shape[0],), x.dtype)
        b2 = jnp.zeros((w2.shape[0],), x.dtype)

    B, D_in = x.shape
    H = w1.shape[0]
    D_out = w2.shape[0]

    # ---- lane-dense layout: zero-pad H / D_out up to 128 lanes (exact math).
    H_p = _lane_pad(H)
    D_out_p = _lane_pad(D_out)

    w1t = _pad_axis(w1.T, 1, H_p)                            # (D_in, Hp)
    w2t = _pad_axis(_pad_axis(w2.T, 0, H_p), 1, D_out_p)     # (Hp, Dp)
    b1r = _pad_axis(b1.reshape(1, H), 1, H_p)                # (1, Hp)
    b2r = _pad_axis(b2.reshape(1, D_out), 1, D_out_p)        # (1, Dp)

    # Fold all scalar constants into one scale applied in the rsqrt epilogue.
    power_scale = (D_out ** 0.5) * (0.5 ** 0.5)
    rel_scale = (1.0 - float(relax_sigma) ** 2) ** 0.5 if relax_sigma > 0 else 1.0
    scale = float(power_scale * rel_scale)

    relax = relax_sigma > 0
    n_row_streams = 3 if relax else 1       # out (+ rel + noise) per batch row

    vmem_limit, vmem_budget = _vmem_limits()

    # Weights/biases stay resident for the whole grid (1 buffer if supported).
    w_bufs = 1 if _HAS_PIPELINE_MODE else 2
    weight_bytes = 4 * w_bufs * (D_in * H_p + H_p * D_out_p + H_p + D_out_p)
    # TODO(synk): add a K-tiled (reduction grid axis over H, acc scratch +
    # pl.when init/finalize) path for hidden sizes whose weights exceed VMEM.
    assert weight_bytes + (4 << 20) < vmem_budget, (
        "meta_transmitter weights do not fit in VMEM; add H tiling")

    # Budget-driven batch tile: double-buffered x / out(/rel/noise) rows plus
    # the live (TILE_B, Hp) activation working set.
    bytes_per_row = 4 * (2 * D_in + 2 * n_row_streams * D_out_p + H_p)
    headroom = 2 << 20
    tile_cap = max(_SUBLANE,
                   (vmem_budget - weight_bytes - headroom) // bytes_per_row)
    tile_cap = min(tile_cap, 4096)          # bound vreg/spill pressure from h

    if B <= _SUBLANE:
        TILE_B = B                          # tiny batch: one full-array tile
    else:
        # >= 2 grid steps when possible -> both v7x TensorCores get work.
        two_step = _round_up(pl.cdiv(B, 2), _SUBLANE)
        TILE_B = max(_SUBLANE, (min(tile_cap, two_step) // _SUBLANE) * _SUBLANE)

    grid = (pl.cdiv(B, TILE_B),)            # partial last tile OK: per-row math

    x_spec = pl.BlockSpec((TILE_B, D_in), lambda i: (i, 0))
    o_spec = pl.BlockSpec((TILE_B, D_out_p), lambda i: (i, 0))
    n_spec = pl.BlockSpec((TILE_B, D_out_p), lambda i: (i, 0))
    w1_spec = _resident_spec((D_in, H_p))
    w2_spec = _resident_spec((H_p, D_out_p))
    b1_spec = _resident_spec((1, H_p))
    b2_spec = _resident_spec((1, D_out_p))

    cp_kwargs = dict(dimension_semantics=("parallel",))
    if vmem_limit is not None:
        cp_kwargs["vmem_limit_bytes"] = int(vmem_limit)
    cparams = pltpu.CompilerParams(**cp_kwargs)

    flops = 2 * B * (D_in * H_p + H_p * D_out_p)
    transcendentals = (0 if if_relu else B * H_p) + B          # tanh + row rsqrt
    base_bytes = 4 * (B * D_in + D_in * H_p + H_p * D_out_p + H_p + D_out_p)

    if relax:
        noise_p = _pad_axis(noise, 1, D_out_p)                 # zero-padded cols
        kernel = _make_relax_kernel(bool(if_relu), scale)
        cost = pl.CostEstimate(
            flops=flops,
            transcendentals=transcendentals,
            bytes_accessed=base_bytes + 4 * (3 * B * D_out_p),  # noise + 2 outs
        )
        y_full, rel_full = pl.pallas_call(
            kernel,
            grid=grid,
            in_specs=[x_spec, w1_spec, b1_spec, w2_spec, b2_spec, n_spec],
            out_specs=(o_spec, o_spec),
            out_shape=(
                jax.ShapeDtypeStruct((B, D_out_p), jnp.float32),
                jax.ShapeDtypeStruct((B, D_out_p), jnp.float32),
            ),
            compiler_params=cparams,
            cost_estimate=cost,
        )(x, w1t, b1r, w2t, b2r, noise_p)
        if D_out_p != D_out:
            y_full = y_full[:, :D_out]
            rel_full = rel_full[:, :D_out]
        return y_full, rel_full
    else:
        kernel = _make_plain_kernel(bool(if_relu), scale)
        cost = pl.CostEstimate(
            flops=flops,
            transcendentals=transcendentals,
            bytes_accessed=base_bytes + 4 * (B * D_out_p),      # single output
        )
        y_full = pl.pallas_call(
            kernel,
            grid=grid,
            in_specs=[x_spec, w1_spec, b1_spec, w2_spec, b2_spec],
            out_specs=o_spec,
            out_shape=jax.ShapeDtypeStruct((B, D_out_p), jnp.float32),
            compiler_params=cparams,
            cost_estimate=cost,
        )(x, w1t, b1r, w2t, b2r)
        if D_out_p != D_out:
            y_full = y_full[:, :D_out]
        # x_rel = x.clone().detach() in PyTorch: same forward values.
        return y_full, y_full


def _reference(x, var, noise, if_bias, if_relu, relax_sigma):
    """Plain-JAX reference mirroring the PyTorch forward."""
    if if_bias:
        w1, b1, w2, b2 = var
    else:
        w1, w2 = var
        b1 = jnp.zeros((w1.shape[0],))
        b2 = jnp.zeros((w2.shape[0],))
    h = x @ w1.T + b1
    h = jnp.maximum(h, 0.0) if if_relu else jnp.tanh(h)
    y = h @ w2.T + b2
    n = jnp.linalg.norm(y, axis=1, keepdims=True)
    y = (y.shape[1] ** 0.5) * (0.5 ** 0.5) * y / n
    if relax_sigma > 0:
        y = ((1 - relax_sigma ** 2) ** 0.5) * y
        y_rel = y + noise
    else:
        y_rel = y
    return y, y_rel


if __name__ == "__main__":
    key = jax.random.PRNGKey(0)
    k_x, k_w1, k_b1, k_w2, k_b2, k_n = jax.random.split(key, 6)

    # Small shapes consistent with the 2-layer MLP transmitter.
    B, D_in, H, D_out = 8, 32, 32, 16
    if_bias = True
    if_relu = True
    relax_sigma = 0.1

    x = jax.random.normal(k_x, (B, D_in), jnp.float32)
    # Deterministic synthetic parameters (PyTorch nn.Linear layout: (out, in)).
    w1 = 0.1 * jax.random.normal(k_w1, (H, D_in), jnp.float32)
    b1 = 0.1 * jax.random.normal(k_b1, (H,), jnp.float32)
    w2 = 0.1 * jax.random.normal(k_w2, (D_out, H), jnp.float32)
    b2 = 0.1 * jax.random.normal(k_b2, (D_out,), jnp.float32)
    var = (w1, b1, w2, b2)

    # Stand-in for Noise_relax.sample() per batch row (Gaussian relaxation noise).
    noise = relax_sigma * jax.random.normal(k_n, (B, D_out), jnp.float32)

    # relax_sigma > 0 path (two outputs).
    x_out, x_rel = meta_transmitter_forward(
        x, var, noise, if_bias=if_bias, if_relu=if_relu, relax_sigma=relax_sigma)
    jax.block_until_ready((x_out, x_rel))
    ref_out, ref_rel = _reference(x, var, noise, if_bias, if_relu, relax_sigma)
    assert x_out.shape == (B, D_out) and x_rel.shape == (B, D_out)
    assert jnp.allclose(x_out, ref_out, atol=1e-5), "x mismatch (relax)"
    assert jnp.allclose(x_rel, ref_rel, atol=1e-5), "x_rel mismatch (relax)"

    # relax_sigma == 0 path (single output, noise never DMA'd).
    x_out0, x_rel0 = meta_transmitter_forward(
        x, var, noise, if_bias=if_bias, if_relu=False, relax_sigma=0.0)
    jax.block_until_ready((x_out0, x_rel0))
    ref_out0, ref_rel0 = _reference(x, var, noise, if_bias, False, 0.0)
    assert jnp.allclose(x_out0, ref_out0, atol=1e-5), "x mismatch (no relax)"
    assert jnp.allclose(x_rel0, ref_rel0, atol=1e-5), "x_rel mismatch (no relax)"

    print("KERNEL_OK")
</pallas_src>

<mosaic_0001>
module attributes {stable_mosaic.version = 11 : i64} {
  func.func @kernel(%arg0: i32, %arg1: memref<8x32xf32, #tpu.memory_space<vmem>>, %arg2: memref<32x128xf32, #tpu.memory_space<vmem>>, %arg3: memref<1x128xf32, #tpu.memory_space<vmem>>, %arg4: memref<128x128xf32, #tpu.memory_space<vmem>>, %arg5: memref<1x128xf32, #tpu.memory_space<vmem>>, %arg6: memref<8x128xf32, #tpu.memory_space<vmem>>, %arg7: memref<8x128xf32, #tpu.memory_space<vmem>>, %arg8: memref<8x128xf32, #tpu.memory_space<vmem>>) attributes {dimension_semantics = [#tpu.dimension_semantics<parallel>], iteration_bounds = array<i64: 1>, scalar_prefetch = 0 : i64, scratch_operands = 0 : i64, tpu.core_type = #tpu.core_type<tc>, window_params = [{transform_indices = @transform_0, window_bounds = array<i64: 8, 32>}, {pipeline_mode = #tpu.pipeline_mode<synchronous>, transform_indices = @transform_1, window_bounds = array<i64: 32, 128>}, {pipeline_mode = #tpu.pipeline_mode<synchronous>, transform_indices = @transform_2, window_bounds = array<i64: 1, 128>}, {pipeline_mode = #tpu.pipeline_mode<synchronous>, transform_indices = @transform_3, window_bounds = array<i64: 128, 128>}, {pipeline_mode = #tpu.pipeline_mode<synchronous>, transform_indices = @transform_4, window_bounds = array<i64: 1, 128>}, {transform_indices = @transform_5, window_bounds = array<i64: 8, 128>}, {transform_indices = @transform_6, window_bounds = array<i64: 8, 128>}, {transform_indices = @transform_7, window_bounds = array<i64: 8, 128>}]} {
    %c0 = arith.constant 0 : index
    %c0_0 = arith.constant 0 : index
    %0 = vector.load %arg1[%c0, %c0_0] : memref<8x32xf32, #tpu.memory_space<vmem>>, vector<8x32xf32>
    %c0_1 = arith.constant 0 : index
    %c0_2 = arith.constant 0 : index
    %1 = vector.load %arg2[%c0_1, %c0_2] : memref<32x128xf32, #tpu.memory_space<vmem>>, vector<32x128xf32>
    %cst = arith.constant dense<0.000000e+00> : vector<8x128xf32>
    %2 = tpu.matmul %0, %1, %cst {dimension_numbers = #tpu.dot_dimension_numbers<[1], [0], [0], [1], [0, 0, 1, 1], [], []>} : vector<8x32xf32>, vector<32x128xf32>, vector<8x128xf32> -> vector<8x128xf32>
    %c0_3 = arith.constant 0 : index
    %c0_4 = arith.constant 0 : index
    %3 = vector.load %arg3[%c0_3, %c0_4] : memref<1x128xf32, #tpu.memory_space<vmem>>, vector<1x128xf32>
    %4 = vector.broadcast %3 : vector<1x128xf32> to vector<8x128xf32>
    %5 = arith.addf %2, %4 : vector<8x128xf32>
    %cst_5 = arith.constant 0.000000e+00 : f32
    %6 = vector.broadcast %cst_5 : f32 to vector<8x128xf32>
    %7 = arith.maximumf %5, %6 : vector<8x128xf32>
    %c0_6 = arith.constant 0 : index
    %c0_7 = arith.constant 0 : index
    %8 = vector.load %arg4[%c0_6, %c0_7] : memref<128x128xf32, #tpu.memory_space<vmem>>, vector<128x128xf32>
    %cst_8 = arith.constant dense<0.000000e+00> : vector<8x128xf32>
    %9 = tpu.matmul %7, %8, %cst_8 {dimension_numbers = #tpu.dot_dimension_numbers<[1], [0], [0], [1], [0, 0, 1, 1], [], []>} : vector<8x128xf32>, vector<128x128xf32>, vector<8x128xf32> -> vector<8x128xf32>
    %c0_9 = arith.constant 0 : index
    %c0_10 = arith.constant 0 : index
    %10 = vector.load %arg5[%c0_9, %c0_10] : memref<1x128xf32, #tpu.memory_space<vmem>>, vector<1x128xf32>
    %11 = vector.broadcast %10 : vector<1x128xf32> to vector<8x128xf32>
    %12 = arith.addf %9, %11 : vector<8x128xf32>
    %13 = arith.mulf %12, %12 : vector<8x128xf32>
    %cst_11 = arith.constant dense<0.000000e+00> : vector<8xf32>
    %14 = vector.multi_reduction <add>, %13, %cst_11 [1] : vector<8x128xf32> to vector<8xf32>
    %15 = vector.shape_cast %14 : vector<8xf32> to vector<8x1xf32>
    %16 = math.rsqrt %15 : vector<8x1xf32>
    %cst_12 = arith.constant 2.81424952 : f32
    %17 = vector.broadcast %cst_12 : f32 to vector<8x1xf32>
    %18 = arith.mulf %17, %16 : vector<8x1xf32>
    %19 = vector.broadcast %18 : vector<8x1xf32> to vector<8x128xf32>
    %20 = arith.mulf %12, %19 : vector<8x128xf32>
    %c0_13 = arith.constant 0 : index
    %c0_14 = arith.constant 0 : index
    %21 = vector.load %arg7[%c0_13, %c0_14] : memref<8x128xf32, #tpu.memory_space<vmem>>, vector<8x128xf32>
    tpu.vector_store %arg7[%c0_13, %c0_14], %20 {strides = array<i32>} : memref<8x128xf32, #tpu.memory_space<vmem>>, vector<8x128xf32>,
    %c0_15 = arith.constant 0 : index
    %c0_16 = arith.constant 0 : index
    %22 = vector.load %arg6[%c0_15, %c0_16] : memref<8x128xf32, #tpu.memory_space<vmem>>, vector<8x128xf32>
    %23 = arith.addf %20, %22 : vector<8x128xf32>
    %c0_17 = arith.constant 0 : index
    %c0_18 = arith.constant 0 : index
    %24 = vector.load %arg8[%c0_17, %c0_18] : memref<8x128xf32, #tpu.memory_space<vmem>>, vector<8x128xf32>
    tpu.vector_store %arg8[%c0_17, %c0_18], %23 {strides = array<i32>} : memref<8x128xf32, #tpu.memory_space<vmem>>, vector<8x128xf32>,
    return
  }
  func.func @transform_0(%arg0: i32) -> (i32, i32) {
    %c0_i32 = arith.constant 0 : i32
    %c0_i32_0 = arith.constant 0 : i32
    return %arg0, %c0_i32 : i32, i32
  }
  func.func @transform_1(%arg0: i32) -> (i32, i32) {
    %c0_i32 = arith.constant 0 : i32
    %c0_i32_0 = arith.constant 0 : i32
    %c0_i32_1 = arith.constant 0 : i32
    return %c0_i32, %c0_i32_0 : i32, i32
  }
  func.func @transform_2(%arg0: i32) -> (i32, i32) {
    %c0_i32 = arith.constant 0 : i32
    %c0_i32_0 = arith.constant 0 : i32
    %c0_i32_1 = arith.constant 0 : i32
    return %c0_i32, %c0_i32_0 : i32, i32
  }
  func.func @transform_3(%arg0: i32) -> (i32, i32) {
    %c0_i32 = arith.constant 0 : i32
    %c0_i32_0 = arith.constant 0 : i32
    %c0_i32_1 = arith.constant 0 : i32
    return %c0_i32, %c0_i32_0 : i32, i32
  }
  func.func @transform_4(%arg0: i32) -> (i32, i32) {
    %c0_i32 = arith.constant 0 : i32
    %c0_i32_0 = arith.constant 0 : i32
    %c0_i32_1 = arith.constant 0 : i32
    return %c0_i32, %c0_i32_0 : i32, i32
  }
  func.func @transform_5(%arg0: i32) -> (i32, i32) {
    %c0_i32 = arith.constant 0 : i32
    %c0_i32_0 = arith.constant 0 : i32
    return %arg0, %c0_i32 : i32, i32
  }
  func.func @transform_6(%arg0: i32) -> (i32, i32) {
    %c0_i32 = arith.constant 0 : i32
    %c0_i32_0 = arith.constant 0 : i32
    return %arg0, %c0_i32 : i32, i32
  }
  func.func @transform_7(%arg0: i32) -> (i32, i32) {
    %c0_i32 = arith.constant 0 : i32
    %c0_i32_0 = arith.constant 0 : i32
    return %arg0, %c0_i32 : i32, i32
  }
}

</mosaic_0001>

<bundles_post_ra>
// kernel: meta_transmitter_forward.1
= control target key start
LH: loop header
LB: loop body
LE: loop exit
PB: predicated region body
PF: predicated region fallthrough
CT: control target
= control target key end

     0   :  { %13 = vsyncpa [#allocation3], 0  ;;  %v401_v3 = vmov 0.0|0.0   ;;  %vm402_vm0 = vmmov 0   ;;  %v403_v6 = vmov 0.0   ;;  %s542_s0 = inlined_call_operand.vmem [shape: f32[8,32], index: 0, kind: input, shape index: {}]   ;;  %s543_s1 = inlined_call_operand.vmem [shape: f32[32,128], index: 1, kind: input, shape index: {}]   ;;  %s544_s2 = inlined_call_operand.vmem [shape: f32[1,128], index: 2, kind: input, shape index: {}]   ;;  %s545_s3 = inlined_call_operand.vmem [shape: f32[128,128], index: 3, kind: input, shape index: {}]   ;;  %s546_s4 = inlined_call_operand.vmem [shape: f32[1,128], index: 4, kind: input, shape index: {}]   ;;  %s547_s5 = inlined_call_operand.vmem [shape: f32[8,128], index: 5, kind: input, shape index: {}]   ;;  %s548_s6 = inlined_call_operand.hbm [shape: f32[8,128], index: 6, kind: output, shape index: {0}]   ;;  %s549_s7 = inlined_call_operand.hbm [shape: f32[8,128], index: 7, kind: output, shape index: {1}]  }
   0x1   :  { %v28_v0 = vld [vmem:[%s543_s1] sm:$0xff]  ;;  %v29_v1 = vld [vmem:[%s543_s1 + $0x8] sm:$0xff]  ;;  %v30_v2 = vld [vmem:[%s543_s1 + $0x10] sm:$0xff]  ;;  %316 = vmatprep.subr.bf16.mxu0 %v401_v3  ;;  %278 = vmatprep.mubr.msk.f32.mxu0 %vm402_vm0, %v403_v6 }
   0x2   :  { %v317_v4 = vpack.c.bf16 %v29_v1, %v28_v0  ;;  %v31_v5 = vld [vmem:[%s543_s1 + $0x18] sm:$0xff]  ;;  %v114_v7 = vld [vmem:[%s545_s3] sm:$0xff]  ;;  %322 = vmatprep.subr.bf16.mxu1 %v401_v3  ;;  %v115_v8 = vld [vmem:[%s545_s3 + $0x8] sm:$0xff]  ;;  %313 = vmatprep.mubr.msk.f32.mxu1 %vm402_vm0, %v403_v6 }
   0x3   :  { %v116_v9 = vld [vmem:[%s545_s3 + $0x10] sm:$0xff]  ;;  %v117_v10 = vld [vmem:[%s545_s3 + $0x18] sm:$0xff]  ;;  %v320_v11 = vpack.c.bf16 %v31_v5, %v30_v2  ;;  %v323_v12 = vpack.c.bf16 %v115_v8, %v114_v7  ;;  %v118_v14 = vld [vmem:[%s545_s3 + $0x20] sm:$0xff] }
   0x4   :  { %318 = vmatpush3.bf16.msra.mxu0 %v317_v4  ;;  %v326_v13 = vpack.c.bf16 %v117_v10, %v116_v9  ;;  %v119_v15 = vld [vmem:[%s545_s3 + $0x28] sm:$0xff] }
   0x5   :  { %319 = vmatprep.subr.bf16.mxu0 %v401_v3  ;;  %324 = vmatpush3.bf16.msra.mxu1 %v323_v12 }
   0x6   :  { %325 = vmatprep.subr.bf16.mxu1 %v401_v3 }
   0x7   :  { %14 = vsyncpa [#allocation5], 0  ;;  %v27_v16 = vld [vmem:[%s542_s0] sm:$0xff]  ;;  %vm39_vm1 = vcmask 261120   ;;  %v329_v17 = vpack.c.bf16 %v119_v15, %v118_v14  ;;  %v120_v18 = vld [vmem:[%s545_s3 + $0x30] sm:$0xff]  ;;  %s405_s23 = smov [#allocation4]  }
   0x8   :  { %321 = vmatpush3.bf16.msra.mxu0 %v320_v11  ;;  %v121_v19 = vld [vmem:[%s545_s3 + $0x38] sm:$0xff]  ;;  %v122_v21 = vld [vmem:[%s545_s3 + $0x40] sm:$0xff]  ;;  %v123_v22 = vld [vmem:[%s545_s3 + $0x48] sm:$0xff]  ;;  %s233_s24 = sshll.u32 %s405_s23, 4  ;;  %s234_s24 = int_to_ptr.vmem [resolvable:$true] %s233_s24 }
   0x9   :  { %327 = vmatpush3.bf16.msra.mxu1 %v326_v13  ;;  %v332_v20 = vpack.c.bf16 %v121_v19, %v120_v18  ;;  %v335_v23 = vpack.c.bf16 %v123_v22, %v122_v21  ;;  %v124_v24 = vld [vmem:[%s545_s3 + $0x50] sm:$0xff]  ;;  %v125_v25 = vld [vmem:[%s545_s3 + $0x58] sm:$0xff]  ;;  %v126_v27 = vld [vmem:[%s545_s3 + $0x60] sm:$0xff] }
   0xa   :  { %328 = vmatprep.subr.bf16.mxu1 %v401_v3  ;;  %v338_v26 = vpack.c.bf16 %v125_v25, %v124_v24  ;;  %v127_v28 = vld [vmem:[%s545_s3 + $0x68] sm:$0xff]  ;;  %v128_v30 = vld [vmem:[%s545_s3 + $0x70] sm:$0xff]  ;;  %v129_v31 = vld [vmem:[%s545_s3 + $0x78] sm:$0xff]  ;;  %s404_s3 = smov [#allocation2]  }
   0xb   :  { %279 = vmatmul.mubr.msk.f32.vlgmr.msra.gmra.mrb[0].mxu0 %vm39_vm1, %v27_v16  ;;  %v341_v29 = vpack.c.bf16 %v127_v28, %v126_v27  ;;  %v344_v32 = vpack.c.bf16 %v129_v31, %v128_v30  ;;  %v245_v33 = vld [vmem:[%s544_s2] ss:$0 sm:$0xff]  ;;  %s223_s21 = sshll.u32 %s404_s3, 4  ;;  %s224_s21 = int_to_ptr.vmem [resolvable:$true] %s223_s21 }
   0xc   :  { %v247_v38 = vld [vmem:[%s546_s4] ss:$0 sm:$0xff]  ;;  %s353_s4 = scalar_lea.vmem %s224_s21, 128  ;;  %p358_p1 = scmp.lt.s32.totalorder %s224_s21, %s224_s21 }
   0xd   :  { %330 = vmatpush3.bf16.msra.mxu1 %v329_v17  ;;  %v214_v46 = vld [vmem:[%s547_s5] sm:$0xff]  ;;  %p354_p0 = scmp.ne.s32.totalorder %s224_s21, %s353_s4  ;;  %p359_p2 = scmp.lt.s32.totalorder %s353_s4, %s353_s4 }
   0xe   :  { %331 = vmatprep.subr.bf16.mxu1 %v401_v3 }
   0xf   :  { %p360_p3 = por %p359_p2, %p358_p1 }
  0x11   :  { %333 = vmatpush3.bf16.msra.mxu1 %v332_v20  ;;  %p361_p4 = pnand %p360_p3, %p354_p0 }
  0x12   :  { %334 = vmatprep.subr.bf16.mxu1 %v401_v3 }
  0x15   :  { %336 = vmatpush3.bf16.msra.mxu1 %v335_v23 }
  0x16   :  { %337 = vmatprep.subr.bf16.mxu1 %v401_v3 }
  0x19   :  { %339 = vmatpush3.bf16.msra.mxu1 %v338_v26 }
  0x1a   :  { %340 = vmatprep.subr.bf16.mxu1 %v401_v3 }
  0x1d   :  { %342 = vmatpush3.bf16.msra.mxu1 %v341_v29 }
  0x1e   :  { %343 = vmatprep.subr.bf16.mxu1 %v401_v3 }
  0x21   :  { %345 = vmatpush3.bf16.msra.mxu1 %v344_v32 }
  0xde   :  { %v109_v34 = vpop.f32.mrb[0].mxu0 }
  0xdf   :  { %v110_v35 = vadd.f32 %v245_v33, %v109_v34  ;;  %v280_v36 = vpop.f32.mrb[1].mxu0 }
  0xe1   :  { %v113_v37 = vmax.f32 %v110_v35, 0.0 }
  0xe3   :  { %314 = vmatmul.mubr.f32.vlgmr.msra.gmra.mrb[0].mxu1 %v113_v37 }
 0x1b6   :  { %v203_v39 = vpop.f32.mrb[0].mxu1 }
 0x1b7   :  { %v204_v40 = vadd.f32 %v247_v38, %v203_v39  ;;  %v315_v41 = vpop.f32.mrb[1].mxu1 }
 0x1b9   :  { %v207_v42 = vmul.f32 %v204_v40, %v204_v40 }
 0x1bb   :  { %208 = vadd.xlane.f32.xlu0 %v207_v42 }
 0x248   :  { %v209_v43 = vpop.xlane.xlu0 %208 }
 0x249   :  { %351 = vrsqrt.f32 %v209_v43 }
 0x253   :  { %v352_v44 = vpop.eup %351 }
 0x254   :  { %v211_v45 = vmul.f32 2.8142495, %v352_v44 }
 0x256   :  { %v212_v47 = vmul.f32 %v211_v45, %v204_v40 }
 0x258   :  { %213 = vst [vmem:[#allocation2] sm:$0xff] %v212_v47  ;;  %v215_v48 = vadd.f32 %v214_v46, %v212_v47 }
 0x259   :  { %364 = shalt.err (!%p361_p4)
}
 0x25a   :  { %s365_s27 = scalar_lea.hbm %s548_s6, 128 }
 0x25b   :  { %p366_p5 = scmp.ne.s32.totalorder %s548_s6, %s365_s27  ;;  %p369_p6 = scmp.lt.u32.totalorder %s365_s27, %s548_s6 }
 0x25d   :  { %p371_p7 = pnand %p369_p6, %p366_p5 }
 0x25f   :  { %374 = shalt.err (!%p371_p7)
}
 0x260   :  { %226 = dma.vmem_to_hbm [thread:$0]  %s224_s21, 128, %s548_s6, [#allocation3]   ;;  %216 = vst [vmem:[#allocation4] sm:$0xff] %v215_v48 }
 0x261   :  { %s375_s9 = scalar_lea.vmem %s234_s24, 128  ;;  %p380_p9 = scmp.lt.s32.totalorder %s234_s24, %s234_s24 }
 0x262   :  { %p376_p8 = scmp.ne.s32.totalorder %s234_s24, %s375_s9  ;;  %p381_p10 = scmp.lt.s32.totalorder %s375_s9, %s375_s9 }
 0x264   :  { %p382_p11 = por %p381_p10, %p380_p9 }
 0x266   :  { %p383_p12 = pnand %p382_p11, %p376_p8 }
 0x268   :  { %386 = shalt.err (!%p383_p12)
}
 0x269   :  { %s387_s12 = scalar_lea.hbm %s549_s7, 128 }
 0x26a   :  { %p388_p13 = scmp.ne.s32.totalorder %s549_s7, %s387_s12  ;;  %p391_p0 = scmp.lt.u32.totalorder %s387_s12, %s549_s7 }
 0x26c   :  { %p393_p1 = pnand %p391_p0, %p388_p13 }
 0x26e   :  { %396 = shalt.err (!%p393_p1)
}
 0x26f   :  { %236 = dma.vmem_to_hbm [thread:$0]  %s234_s24, 128, %s549_s7, [#allocation5]  }
 0x270   :  { %397 = dma.done.wait [#allocation3], 128  }
 0x271   :  { %398 = vsyncadd [#allocation3], 4294967168 }
 0x272   :  { %399 = dma.done.wait [#allocation5], 128  }
 0x273   :  { %400 = vsyncadd [#allocation5], 4294967168 }
 0x274   :  { %243 = vsyncpa [#allocation3], 1 }
 0x275   :  { %244 = vsyncpa [#allocation5], 1 }

</bundles_post_ra>
